<compile_context>
chip_gen: v6e
topology: v6e:2x2x1
jax: 0.10.0
libtpu: 0.0.40
codegen_flags: <defaults>
</compile_context>

<pallas_src>
import jax
import jax.numpy as jnp
from jax.experimental import pallas as pl
from jax.experimental.pallas import tpu as pltpu

H_DIM = 128
BN_EPS = 1e-5

# Rows of the packed parameter slab (8, 128).
ROW_GAMMA, ROW_BETA, ROW_W2T, ROW_B2 = 0, 1, 2, 3


def dis_kernel(x_ref, w1_ref, p_ref, out_ref, acc_ref):
    k = pl.program_id(0)

    @pl.when(k == 0)
    def _():
        acc_ref[...] = jnp.zeros_like(acc_ref)

    # Linear1 partial product (MXU). b1 is omitted: training-mode BatchNorm's
    # batch-mean subtraction cancels a constant per-feature offset exactly.
    x_blk = x_ref[...]
    w_blk = w1_ref[...]
    if x_blk.dtype != w_blk.dtype:
        # One stream is bf16: run the MXU natively in bf16, accumulate in f32.
        x_blk = x_blk.astype(jnp.bfloat16)
        w_blk = w_blk.astype(jnp.bfloat16)
    acc_ref[...] += jnp.dot(x_blk, w_blk, preferred_element_type=jnp.float32)

    @pl.when(k == pl.num_programs(0) - 1)
    def _():
        h = acc_ref[...]                                    # (B, H) f32
        gamma = p_ref[pl.ds(ROW_GAMMA, 1), :]               # (1, H)
        beta = p_ref[pl.ds(ROW_BETA, 1), :]                 # (1, H)
        w2t = p_ref[pl.ds(ROW_W2T, 1), :]                   # (1, H)
        b2 = p_ref[pl.ds(ROW_B2, 1), :][:, 0:1]             # (1, 1)

        # BatchNorm1d, training mode: biased (/n) batch statistics; affine
        # folded into a single per-feature scale/shift.
        # NOTE: assumes the whole batch B lives in this one block; any future
        # B-tiling must combine partial sum / sum-of-squares across B tiles.
        n = h.shape[0]
        inv_n = 1.0 / n
        mean = jnp.sum(h, axis=0, keepdims=True) * inv_n    # (1, H)
        centered = h - mean
        var = jnp.sum(centered * centered, axis=0, keepdims=True) * inv_n
        scale = gamma * jax.lax.rsqrt(var + BN_EPS)         # (1, H)
        shift = beta - mean * scale                         # (1, H)
        h_bn = h * scale + shift                            # (B, H)

        # ReLU
        h_relu = jnp.maximum(h_bn, 0.0)

        # Linear2 (H -> 1) as VPU multiply + lane reduction (XLU), then Sigmoid.
        logit = jnp.sum(h_relu * w2t, axis=-1, keepdims=True) + b2
        out_ref[...] = jax.nn.sigmoid(logit)                # (B, 1)


def _round_up(a, b):
    return ((a + b - 1) // b) * b


def _vmem_capacity_bytes():
    try:
        return int(pltpu.get_tpu_info().vmem_capacity_bytes)
    except Exception:
        return 64 << 20  # conservative fallback (v7x-sized per-core VMEM)


def _pick_tiling(B, X_dim, x_itemsize, w_itemsize, vmem_budget):
    """Largest K tile (and buffer depth) whose pipeline fits the VMEM budget."""
    x_pad128 = _round_up(max(X_dim, 1), 128)
    candidates = [t for t in (4096, 2048, 1024, 512, 256, 128) if t <= x_pad128]
    if not candidates:
        candidates = [x_pad128]

    def need(tk, n_buf):
        return (B * H_DIM * 4                       # f32 accumulator (scratch)
                + n_buf * B * tk * x_itemsize       # pipelined x tiles
                + n_buf * tk * H_DIM * w_itemsize   # pipelined w1 tiles
                + n_buf * 8 * H_DIM * 4             # param slab buffers
                + 2 * B * 128 * 4)                  # output tile (lane-padded)

    def best(n_buf):
        for t in candidates:
            if need(t, n_buf) <= vmem_budget:
                return t
        return None

    tk2, tk3 = best(2), best(3)
    if tk3 is not None and tk3 == tk2:
        return tk3, 3, need(tk3, 3)     # deeper pipelining at no tk cost
    if tk2 is not None:
        return tk2, 2, need(tk2, 2)
    tk = candidates[-1]                  # nothing fits nominally: smallest tile
    return tk, 2, need(tk, 2)


def _input_spec(block_shape, index_map, n_buf):
    if n_buf == 2:
        return pl.BlockSpec(block_shape, index_map)
    try:
        return pl.BlockSpec(block_shape, index_map,
                            pipeline_mode=pl.Buffered(n_buf))
    except TypeError:  # API without pipeline_mode: fall back to default depth
        return pl.BlockSpec(block_shape, index_map)


def dis_forward(x, w1, b1, gamma, beta, w2, b2, *, stream_dtype=jnp.bfloat16):
    del b1  # mathematically a no-op under training-mode BatchNorm
    B, X_dim = x.shape

    # Stream the HBM-dominant operand(s) in bf16; accumulation stays f32.
    if stream_dtype != jnp.float32:
        w1 = w1.astype(stream_dtype)      # w1 traffic dominates for B <~ 128
        if B >= 256:
            x = x.astype(stream_dtype)    # x traffic dominates for large B

    capacity = _vmem_capacity_bytes()
    vmem_budget = max(capacity - (16 << 20), capacity // 2)
    tk, n_buf, vmem_need = _pick_tiling(
        B, X_dim, x.dtype.itemsize, w1.dtype.itemsize, vmem_budget)

    # Zero-pad K so non-multiple X_dim (e.g. 784) keeps the streaming pipeline;
    # zero columns/rows contribute nothing to the matmul.
    K_pad = pl.cdiv(X_dim, tk) * tk
    if K_pad != X_dim:
        x = jnp.pad(x, ((0, 0), (0, K_pad - X_dim)))
        w1 = jnp.pad(w1, ((0, K_pad - X_dim), (0, 0)))
    n_k = K_pad // tk

    # Deeper input buffering only pays off on longer K pipelines.
    if n_k < 3:
        n_buf = 2

    # Pack all small per-feature parameters into one (8, 128) f32 slab.
    slab = jnp.zeros((8, H_DIM), jnp.float32)
    slab = slab.at[ROW_GAMMA].set(gamma)
    slab = slab.at[ROW_BETA].set(beta)
    slab = slab.at[ROW_W2T].set(w2.reshape(-1))
    slab = slab.at[ROW_B2].set(b2[0])

    cost = pl.CostEstimate(
        flops=2 * B * K_pad * H_DIM + 12 * B * H_DIM,
        transcendentals=B + H_DIM,
        bytes_accessed=(x.size * x.dtype.itemsize
                        + w1.size * w1.dtype.itemsize
                        + 8 * H_DIM * 4 + B * 4),
    )
    vmem_limit = int(min(capacity, max(vmem_need + (16 << 20), 32 << 20)))

    return pl.pallas_call(
        dis_kernel,
        out_shape=jax.ShapeDtypeStruct((B, 1), jnp.float32),
        grid_spec=pltpu.PrefetchScalarGridSpec(
            num_scalar_prefetch=0,
            grid=(n_k,),
            in_specs=[
                _input_spec((B, tk), lambda k: (0, k), n_buf),      # x slice
                _input_spec((tk, H_DIM), lambda k: (k, 0), n_buf),  # w1 slice
                pl.BlockSpec((8, H_DIM), lambda k: (0, 0)),         # param slab
            ],
            out_specs=pl.BlockSpec((B, 1), lambda k: (0, 0)),
            scratch_shapes=[pltpu.VMEM((B, H_DIM), jnp.float32)],
        ),
        compiler_params=pltpu.CompilerParams(
            dimension_semantics=("arbitrary",),   # K is a reduction axis
            vmem_limit_bytes=vmem_limit),
        cost_estimate=cost,
    )(x, w1, slab)


def init_params(key, x_dim):
    # PyTorch-style uniform(-1/sqrt(fan_in), 1/sqrt(fan_in)) init.
    k1, k2, k3, k4 = jax.random.split(key, 4)
    bound1 = 1.0 / jnp.sqrt(x_dim)
    w1 = jax.random.uniform(k1, (x_dim, H_DIM), jnp.float32, -bound1, bound1)
    b1 = jax.random.uniform(k2, (H_DIM,), jnp.float32, -bound1, bound1)
    gamma = jnp.ones((H_DIM,), jnp.float32)
    beta = jnp.zeros((H_DIM,), jnp.float32)
    bound2 = 1.0 / jnp.sqrt(H_DIM)
    w2 = jax.random.uniform(k3, (H_DIM, 1), jnp.float32, -bound2, bound2)
    b2 = jax.random.uniform(k4, (1,), jnp.float32, -bound2, bound2)
    return w1, b1, gamma, beta, w2, b2


def reference(x, w1, b1, gamma, beta, w2, b2):
    # Plain-JAX reference: same math as the PyTorch module (with b1; the kernel
    # drops it because training-mode BN cancels it exactly).
    # TODO(synk): BatchNorm1d running_mean/running_var buffer updates are not
    # computed anywhere (forward output does not depend on them).
    h = x @ w1 + b1
    mean = h.mean(axis=0, keepdims=True)
    var = ((h - mean) ** 2).mean(axis=0, keepdims=True)
    h_bn = gamma * (h - mean) / jnp.sqrt(var + BN_EPS) + beta
    return jax.nn.sigmoid(jnp.maximum(h_bn, 0.0) @ w2 + b2)


if __name__ == "__main__":
    key = jax.random.PRNGKey(0)
    k1, k2, k3, k4 = jax.random.split(key, 4)

    # Case 1: MNIST-like (B, 1, 28, 28) -> X_dim = 784. Exercises K zero-padding
    # and the multi-step accumulator, with pure-f32 streaming -> tight parity.
    imgs1 = jax.random.normal(k1, (8, 1, 28, 28), jnp.float32)
    x1 = imgs1.reshape(imgs1.shape[0], -1)                 # (8, 784)
    p1 = init_params(k2, x1.shape[1])
    out1 = dis_forward(x1, *p1, stream_dtype=jnp.float32)
    jax.block_until_ready(out1)
    ref1 = reference(x1, *p1)
    assert out1.shape == (8, 1)
    assert jnp.allclose(out1, ref1, atol=1e-5, rtol=1e-5), (
        float(jnp.max(jnp.abs(out1 - ref1))))

    # Case 2: 64x64 RGB (B, 3, 64, 64) -> X_dim = 12288. Exercises the 4096-wide
    # K tiles, 3-deep input buffering and bf16-streamed w1 (bf16 MXU tolerance).
    imgs2 = jax.random.normal(k3, (8, 3, 64, 64), jnp.float32)
    x2 = imgs2.reshape(imgs2.shape[0], -1)                 # (8, 12288)
    p2 = init_params(k4, x2.shape[1])
    out2 = dis_forward(x2, *p2)                            # default bf16 stream
    jax.block_until_ready(out2)
    ref2 = reference(x2, *p2)
    assert out2.shape == (8, 1)
    assert jnp.allclose(out2, ref2, atol=5e-3, rtol=5e-3), (
        float(jnp.max(jnp.abs(out2 - ref2))))

    print("KERNEL_OK")
</pallas_src>

<mosaic_0001>
module attributes {stable_mosaic.version = 11 : i64} {
  func.func @dis_kernel(%arg0: i32, %arg1: memref<8x512xf32, #tpu.memory_space<vmem>>, %arg2: memref<512x128xf32, #tpu.memory_space<vmem>>, %arg3: memref<8x128xf32, #tpu.memory_space<vmem>>, %arg4: memref<8x1xf32, #tpu.memory_space<vmem>>, %arg5: memref<8x128xf32, #tpu.memory_space<vmem>>) attributes {dimension_semantics = [#tpu.dimension_semantics<arbitrary>], iteration_bounds = array<i64: 2>, scalar_prefetch = 0 : i64, scratch_operands = 1 : i64, tpu.core_type = #tpu.core_type<tc>, window_params = [{transform_indices = @transform_0, window_bounds = array<i64: 8, 512>}, {transform_indices = @transform_1, window_bounds = array<i64: 512, 128>}, {pipeline_mode = #tpu.pipeline_mode<synchronous>, transform_indices = @transform_2, window_bounds = array<i64: 8, 128>}, {pipeline_mode = #tpu.pipeline_mode<synchronous>, transform_indices = @transform_3, window_bounds = array<i64: 8, 1>}]} {
    %c0_i32 = arith.constant 0 : i32
    %0 = arith.cmpi eq, %arg0, %c0_i32 : i32
    %1 = arith.extui %0 : i1 to i32
    %c0_i32_0 = arith.constant 0 : i32
    %2 = arith.cmpi ne, %1, %c0_i32_0 : i32
    scf.if %2 {
      %cst_9 = arith.constant 0.000000e+00 : f32
      %12 = vector.broadcast %cst_9 : f32 to vector<8x128xf32>
      %c0_10 = arith.constant 0 : index
      %c0_11 = arith.constant 0 : index
      %13 = vector.load %arg5[%c0_10, %c0_11] : memref<8x128xf32, #tpu.memory_space<vmem>>, vector<8x128xf32>
      tpu.vector_store %arg5[%c0_10, %c0_11], %12 {strides = array<i32>} : memref<8x128xf32, #tpu.memory_space<vmem>>, vector<8x128xf32>,
    } else {
    }
    %c0 = arith.constant 0 : index
    %c0_1 = arith.constant 0 : index
    %3 = vector.load %arg1[%c0, %c0_1] : memref<8x512xf32, #tpu.memory_space<vmem>>, vector<8x512xf32>
    %c0_2 = arith.constant 0 : index
    %c0_3 = arith.constant 0 : index
    %4 = vector.load %arg2[%c0_2, %c0_3] : memref<512x128xf32, #tpu.memory_space<vmem>>, vector<512x128xf32>
    %c0_4 = arith.constant 0 : index
    %c0_5 = arith.constant 0 : index
    %5 = vector.load %arg5[%c0_4, %c0_5] : memref<8x128xf32, #tpu.memory_space<vmem>>, vector<8x128xf32>
    %cst = arith.constant dense<0.000000e+00> : vector<8x128xf32>
    %6 = tpu.matmul %3, %4, %cst {dimension_numbers = #tpu.dot_dimension_numbers<[1], [0], [0], [1], [0, 0, 1, 1], [], []>} : vector<8x512xf32>, vector<512x128xf32>, vector<8x128xf32> -> vector<8x128xf32>
    %7 = arith.addf %5, %6 : vector<8x128xf32>
    %c0_6 = arith.constant 0 : index
    %c0_7 = arith.constant 0 : index
    %8 = vector.load %arg5[%c0_6, %c0_7] : memref<8x128xf32, #tpu.memory_space<vmem>>, vector<8x128xf32>
    tpu.vector_store %arg5[%c0_6, %c0_7], %7 {strides = array<i32>} : memref<8x128xf32, #tpu.memory_space<vmem>>, vector<8x128xf32>,
    %c1_i32 = arith.constant 1 : i32
    %9 = arith.cmpi eq, %arg0, %c1_i32 : i32
    %10 = arith.extui %9 : i1 to i32
    %c0_i32_8 = arith.constant 0 : i32
    %11 = arith.cmpi ne, %10, %c0_i32_8 : i32
    scf.if %11 {
      %c0_9 = arith.constant 0 : index
      %c0_10 = arith.constant 0 : index
      %12 = vector.load %arg5[%c0_9, %c0_10] : memref<8x128xf32, #tpu.memory_space<vmem>>, vector<8x128xf32>
      %c0_11 = arith.constant 0 : index
      %c0_12 = arith.constant 0 : index
      %13 = vector.load %arg3[%c0_11, %c0_12] : memref<8x128xf32, #tpu.memory_space<vmem>>, vector<1x128xf32>
      %c1 = arith.constant 1 : index
      %c0_13 = arith.constant 0 : index
      %14 = vector.load %arg3[%c1, %c0_13] : memref<8x128xf32, #tpu.memory_space<vmem>>, vector<1x128xf32>
      %c2 = arith.constant 2 : index
      %c0_14 = arith.constant 0 : index
      %15 = vector.load %arg3[%c2, %c0_14] : memref<8x128xf32, #tpu.memory_space<vmem>>, vector<1x128xf32>
      %c3 = arith.constant 3 : index
      %c0_15 = arith.constant 0 : index
      %16 = vector.load %arg3[%c3, %c0_15] : memref<8x128xf32, #tpu.memory_space<vmem>>, vector<1x128xf32>
      %17 = vector.extract_strided_slice %16 {offsets = [0, 0], sizes = [1, 1], strides = [1, 1]} : vector<1x128xf32> to vector<1x1xf32>
      %cst_16 = arith.constant dense<0.000000e+00> : vector<128xf32>
      %18 = vector.multi_reduction <add>, %12, %cst_16 [0] : vector<8x128xf32> to vector<128xf32>
      %19 = vector.shape_cast %18 : vector<128xf32> to vector<1x128xf32>
      %cst_17 = arith.constant 1.250000e-01 : f32
      %20 = vector.broadcast %cst_17 : f32 to vector<1x128xf32>
      %21 = arith.mulf %19, %20 : vector<1x128xf32>
      %22 = vector.broadcast %21 : vector<1x128xf32> to vector<8x128xf32>
      %23 = arith.subf %12, %22 : vector<8x128xf32>
      %24 = arith.mulf %23, %23 : vector<8x128xf32>
      %cst_18 = arith.constant dense<0.000000e+00> : vector<128xf32>
      %25 = vector.multi_reduction <add>, %24, %cst_18 [0] : vector<8x128xf32> to vector<128xf32>
      %26 = vector.shape_cast %25 : vector<128xf32> to vector<1x128xf32>
      %cst_19 = arith.constant 1.250000e-01 : f32
      %27 = vector.broadcast %cst_19 : f32 to vector<1x128xf32>
      %28 = arith.mulf %26, %27 : vector<1x128xf32>
      %cst_20 = arith.constant 9.99999974E-6 : f32
      %29 = vector.broadcast %cst_20 : f32 to vector<1x128xf32>
      %30 = arith.addf %28, %29 : vector<1x128xf32>
      %31 = math.rsqrt %30 : vector<1x128xf32>
      %32 = arith.mulf %13, %31 : vector<1x128xf32>
      %33 = arith.mulf %21, %32 : vector<1x128xf32>
      %34 = arith.subf %14, %33 : vector<1x128xf32>
      %35 = vector.broadcast %32 : vector<1x128xf32> to vector<8x128xf32>
      %36 = arith.mulf %12, %35 : vector<8x128xf32>
      %37 = vector.broadcast %34 : vector<1x128xf32> to vector<8x128xf32>
      %38 = arith.addf %36, %37 : vector<8x128xf32>
      %cst_21 = arith.constant 0.000000e+00 : f32
      %39 = vector.broadcast %cst_21 : f32 to vector<8x128xf32>
      %40 = arith.maximumf %38, %39 : vector<8x128xf32>
      %41 = vector.broadcast %15 : vector<1x128xf32> to vector<8x128xf32>
      %42 = arith.mulf %40, %41 : vector<8x128xf32>
      %cst_22 = arith.constant dense<0.000000e+00> : vector<8xf32>
      %43 = vector.multi_reduction <add>, %42, %cst_22 [1] : vector<8x128xf32> to vector<8xf32>
      %44 = vector.shape_cast %43 : vector<8xf32> to vector<8x1xf32>
      %45 = vector.broadcast %17 : vector<1x1xf32> to vector<8x1xf32>
      %46 = arith.addf %44, %45 : vector<8x1xf32>
      %47 = arith.negf %46 : vector<8x1xf32>
      %48 = math.exp %47 : vector<8x1xf32>
      %cst_23 = arith.constant 1.000000e+00 : f32
      %49 = vector.broadcast %cst_23 : f32 to vector<8x1xf32>
      %50 = arith.addf %49, %48 : vector<8x1xf32>
      %51 = arith.divf %49, %50 : vector<8x1xf32>
      %c0_24 = arith.constant 0 : index
      %c0_25 = arith.constant 0 : index
      %52 = vector.load %arg4[%c0_24, %c0_25] : memref<8x1xf32, #tpu.memory_space<vmem>>, vector<8x1xf32>
      tpu.vector_store %arg4[%c0_24, %c0_25], %51 {strides = array<i32>} : memref<8x1xf32, #tpu.memory_space<vmem>>, vector<8x1xf32>,
    } else {
    }
    return
  }
  func.func @transform_0(%arg0: i32) -> (i32, i32) {
    %c0_i32 = arith.constant 0 : i32
    %c0_i32_0 = arith.constant 0 : i32
    return %c0_i32, %arg0 : i32, i32
  }
  func.func @transform_1(%arg0: i32) -> (i32, i32) {
    %c0_i32 = arith.constant 0 : i32
    %c0_i32_0 = arith.constant 0 : i32
    return %arg0, %c0_i32 : i32, i32
  }
  func.func @transform_2(%arg0: i32) -> (i32, i32) {
    %c0_i32 = arith.constant 0 : i32
    %c0_i32_0 = arith.constant 0 : i32
    %c0_i32_1 = arith.constant 0 : i32
    return %c0_i32, %c0_i32_0 : i32, i32
  }
  func.func @transform_3(%arg0: i32) -> (i32, i32) {
    %c0_i32 = arith.constant 0 : i32
    %c0_i32_0 = arith.constant 0 : i32
    %c0_i32_1 = arith.constant 0 : i32
    return %c0_i32, %c0_i32_0 : i32, i32
  }
}

</mosaic_0001>

<bundles_post_ra>
// kernel: tpu_custom_call.1
= control target key start
LH: loop header
LB: loop body
LE: loop exit
PB: predicated region body
PF: predicated region fallthrough
CT: control target
= control target key end

     0   :  { %8 = vsyncpa [#allocation4], 0  ;;  %s1139_s0 = inlined_call_operand.hbm [shape: f32[8,1024], index: 0, kind: input, shape index: {}]   ;;  %s1140_s1 = inlined_call_operand.hbm [shape: f32[1024,128], index: 1, kind: input, shape index: {}]   ;;  %s1141_s2 = inlined_call_operand.hbm [shape: f32[8,128], index: 2, kind: input, shape index: {}]   ;;  %s1142_s3 = inlined_call_operand.vmem [shape: f32[8,1], index: 3, kind: output, shape index: {}]  }
   0x1   :  { %10 = vsyncpa [#allocation4 + $0x1], 0 }
   0x2   :  { %11 = vsyncpa [#allocation6], 0 }
   0x3   :  { %13 = vsyncpa [#allocation6 + $0x1], 0  ;;  %s885_s12 = smov 0   ;;  %s887_s13 = smov 0  }
   0x4   :  { %s889_s14 = smov 0   ;;  %s891_s15 = smov 0  }
   0x5 LB: > { %s904_s16 = sadd.s32 4294967295, %s857_s15   ;;  %s907_s17 = sadd.s32 1, %s857_s15   ;;  %s857_s15 = sphi %s891_s15, %s1156_s15   ;;  %s853_s14 = sphi %s889_s14, %s1155_s14   ;;  %s849_s13 = sphi %s887_s13, %s1154_s13   ;;  %s845_s12 = sphi %s885_s12, %s1153_s12  }
   0x6   : > { %s23_s18 = ssub.s32 %s857_s15, %s907_s17  ;;  %s26_s19 = sadd.s32 1, %s853_s14 }
   0x7   : > { %p24_p0 = scmp.eq.s32.totalorder %s23_s18, 0  ;;  %p33_p1 = scmp.ne.s32.totalorder %s853_s14, %s849_s13 }
   0x8   : > { %p39_p2 = scmp.ne.s32.totalorder %s849_s13, %s845_s12  ;;  %p40_p3 = scmp.eq.s32.totalorder %s904_s16, 0 }
   0x9   : > { %s917_s20 = scalar_select %p24_p0, %s853_s14, %s26_s19  }
   0xa   : > { %p921_p4 = por %p40_p3, %p39_p2  ;;  %p577_p5 = scmp.ge.s32.totalorder %s857_s15, 1 }
   0xb   : > { %p118_p6 = scmp.lt.s32.totalorder %s857_s15, 3  ;;  %s859_s23 = smov [#allocation7]  }
   0xc   : > { %s1145_s21 = scalar_select %p921_p4, 1, 0 }
   0xd   : > { %p928_p8 = pnand %p577_p5, %p118_p6  ;;  %s131_s24 = sshll.u32 %s859_s23, 4  ;;  %s132_s24 = int_to_ptr.vmem [resolvable:$true] %s131_s24 }
   0xe   : > { %p34_p9 = scmp.eq.s32.totalorder %s857_s15, 0  ;;  %s944_s26 = sand.u32 1, %s853_s14  }
   0xf   : > { %s1146_s22 = scalar_select %p928_p8, 1, 0 }
  0x10   : > { %p677_p10 = pneg %p928_p8  ;;  %p939_p12 = por %p34_p9, %p33_p1 }
  0x11   : > { %s580_s27 = sshll.u32 %s944_s26, 5  ;;  %s597_s28 = sshll.u32 %s857_s15, 9 }
  0x12   : > { %p678_p13 = pnand %p677_p10, %p40_p3  ;;  %s744_s29 = scalar_lea.vmem %s132_s24, 128 }
  0x13   : > { %p745_p2 = scmp.ne.s32.totalorder %s132_s24, %s744_s29  ;;  %p752_p7 = scmp.lt.s32.totalorder %s132_s24, %s132_s24 }
  0x14   : > { %p735_p0 = pneg %p678_p13  ;;  %p753_p4 = scmp.lt.s32.totalorder %s744_s29, %s744_s29 }
  0x16   : > { %p747_p5 = pnand %p745_p2, %p735_p0  ;;  %p754_p11 = por %p753_p4, %p752_p7 }
  0x18   : > { %p748_p6 = pneg %p747_p5 }
  0x1a   : > { %p755_p8 = pnand %p754_p11, %p748_p6 }
  0x1c   : > { %758 = shalt.err (!%p755_p8)
}
  0x1d   : > { %680 = dma.hbm_to_vmem [thread:$0]  (!%p678_p13), %s1141_s2, 128, %s132_s24, [#allocation6]  }
  0x1e   : > { %s956_s7 = scalar_lea.hbm %s1139_s0, %s597_s28  ;;  %s146_s8 = scalar_lea.vmem [#allocation3], %s580_s27 }
  0x1f   : > { %s154_s9 = sshll.u32 %s146_s8, 4  ;;  %p1148_p1 = scmp.lt.s32.totalorder %s857_s15, 2  ;;  %s958_s9 = int_to_ptr.vmem [resolvable:$true] %s154_s9 }
  0x20   : > { %s583_s11 = sshll.u32 %s944_s26, 9  ;;  %s161_s12 = sand.u32 1, %s857_s15  }
  0x21   : > { %p964_p4 = pnand %p1148_p1, %p939_p12  ;;  %s143_s18 = scalar_lea.sflag [#allocation4], %s944_s26 }
  0x22   : > { %s759_s19 = scalar_lea.hbm %s956_s7, 512  ;;  %s764_s25 = scalar_lea.hbm %s1139_s0, 1024 }
  0x23   : > { %p760_p7 = scmp.ne.s32.totalorder %s956_s7, %s759_s19  ;;  %p761_p8 = pneg %p964_p4 }
  0x24   : > { %p765_p11 = scmp.lt.s32.totalorder %s956_s7, %s1139_s0  ;;  %p766_p12 = scmp.lt.s32.totalorder %s764_s25, %s759_s19 }
  0x25   : > { %p762_p9 = pnand %p761_p8, %p760_p7 }
  0x26   : > { %p767_p13 = por %p766_p12, %p765_p11 }
  0x27   : > { %p763_p10 = pneg %p762_p9 }
  0x29   : > { %p768_p0 = pnand %p767_p13, %p763_p10 }
  0x2b   : > { %771 = shalt.err (!%p768_p0)
}
  0x2c   : > { %s772_s29 = scalar_lea.vmem %s958_s9, 512  ;;  %s860_s30 = smov [#allocation3]  }
  0x2d   : > { %p773_p2 = scmp.ne.s32.totalorder %s958_s9, %s772_s29  ;;  %s777_s4 = sshll.u32 %s860_s30, 4  ;;  %s778_s4 = int_to_ptr.vmem [resolvable:$false] %s777_s4 }
  0x2e   : > { %s779_s5 = scalar_lea.vmem %s778_s4, 1024  ;;  %p780_p1 = scmp.lt.s32.totalorder %s958_s9, %s778_s4 }
  0x2f   : > { %p775_p5 = pnand %p773_p2, %p761_p8  ;;  %p781_p7 = scmp.lt.s32.totalorder %s779_s5, %s772_s29 }
  0x31   : > { %p776_p6 = pneg %p775_p5  ;;  %p782_p9 = por %p781_p7, %p780_p1 }
  0x33   : > { %p783_p11 = pnand %p782_p9, %p776_p6 }
  0x35   : > { %786 = shalt.err (!%p783_p11)
}
  0x36   : > { %684 = dma.hbm_to_vmem [thread:$0]  (!%p964_p4), %s956_s7, 512, %s958_s9, %s143_s18  }
  0x37   : > { %s165_s6 = scalar_lea.vmem [#allocation5], %s583_s11  ;;  %s598_s19 = sshll.u32 %s857_s15, 13 }
  0x38   : > { %s172_s8 = sshll.u32 %s165_s6, 4  ;;  %s1003_s25 = scalar_lea.hbm %s1140_s1, %s598_s19  ;;  %s997_s8 = int_to_ptr.vmem [resolvable:$true] %s172_s8 }
  0x39   : > { %s1007_s27 = scalar_lea.sflag [#allocation6], %s161_s12  ;;  %s787_s28 = scalar_lea.hbm %s1003_s25, 8192 }
  0x3a   : > { %p788_p10 = scmp.ne.s32.totalorder %s1003_s25, %s787_s28  ;;  %s792_s9 = scalar_lea.hbm %s1140_s1, 16384 }
  0x3b   : > { %p793_p0 = scmp.lt.s32.totalorder %s1003_s25, %s1140_s1  ;;  %p794_p2 = scmp.lt.s32.totalorder %s792_s9, %s787_s28 }
  0x3c   : > { %p790_p12 = pnand %p788_p10, %p761_p8 }
  0x3d   : > { %p795_p5 = por %p794_p2, %p793_p0 }
  0x3e   : > { %p791_p13 = pneg %p790_p12 }
  0x40   : > { %p796_p6 = pnand %p795_p5, %p791_p13 }
  0x42   : > { %799 = shalt.err (!%p796_p6)
}
  0x43   : > { %s800_s15 = scalar_lea.vmem %s997_s8, 8192  ;;  %s861_s12 = smov [#allocation5]  }
  0x44   : > { %p801_p1 = scmp.ne.s32.totalorder %s997_s8, %s800_s15  ;;  %s805_s29 = sshll.u32 %s861_s12, 4  ;;  %s806_s29 = int_to_ptr.vmem [resolvable:$false] %s805_s29 }
  0x45   : > { %s807_s30 = scalar_lea.vmem %s806_s29, 16384  ;;  %p808_p11 = scmp.lt.s32.totalorder %s997_s8, %s806_s29 }
  0x46   : > { %p803_p7 = pnand %p801_p1, %p761_p8  ;;  %p809_p10 = scmp.lt.s32.totalorder %s807_s30, %s800_s15 }
  0x48   : > { %p804_p9 = pneg %p803_p7  ;;  %p810_p12 = por %p809_p10, %p808_p11 }
  0x4a   : > { %p811_p0 = pnand %p810_p12, %p804_p9 }
  0x4c   : > { %814 = shalt.err (!%p811_p0)
}
  0x4d   : > { %s862_s4 = smov 128   ;;  %s863_s5 = smov 8  }
  0x4e   : > { %687 = dma.hbm_to_vmem [thread:$0]  (!%p964_p4), %s1003_s25, 8192, %s997_s8, %s1007_s27, %s862_s4, %s862_s4, %s863_s5  }
  0x4f   : > { %p1150_p8 = scmp.ne.s32.totalorder %s1146_s22, 0 }
  0x50   : > { %s186_s6 = sand.u32 (!%p1150_p8), 1, %s849_s13   ;;  %p1151_p13 = scmp.ne.s32.totalorder (!%p1150_p8), %s1145_s21, 0 }
  0x51   : > { %184 = sbr.rel (%p1150_p8) target bundleno = 581 (0x245), region = 32  ;;  %s587_s19 = sshll.u32 (!%p1150_p8), %s186_s6, 5 }
  0x52   : > { %s187_s23 = scalar_lea.sflag (!%p1150_p8), [#allocation4], %s186_s6  ;;  %s1035_s24 = scalar_lea.vmem (!%p1150_p8), [#allocation3], %s587_s19 }
  0x56   : > { %832 = dma.done.wait (%p1151_p13), %s187_s23, 512  }
  0x57   : > { %834 = vsyncadd (%p1151_p13), %s187_s23, 4294966784  ;;  %s195_s28 = sand.u32 1, %s904_s16   ;;  %s588_s10 = sshll.u32 %s186_s6, 9 }
  0x58   : > { %s196_s8 = scalar_lea.sflag [#allocation6], %s195_s28  ;;  %s1042_s25 = scalar_lea.vmem [#allocation5], %s588_s10 }
  0x59   : > { %836 = dma.done.wait (%p1151_p13), %s196_s8, 8192  }
  0x5a   : > { %838 = vsyncadd (%p1151_p13), %s196_s8, 4294959104 }
  0x5b   : > { %840 = dma.done.wait (%p40_p3), [#allocation6], 128  }
  0x5c   : > { %842 = vsyncadd (%p40_p3), [#allocation6], 4294967168  ;;  %p1152_p4 = scmp.ne.s32.totalorder %s904_s16, 0 }
  0x5e   : > { %231 = sbr.rel (%p1152_p4) target bundleno = 101 (0x65), region = 48 }
  0x63   : > { %v864_v0 = vmov 0.0  }
  0x64   : > { %232 = vst [vmem:[#allocation2] sm:$0xff] %v864_v0 }
  0x65 PF: > { %v268_v1 = vld [vmem:[%s1042_s25 + $0xf8] sm:$0xff]  ;;  %v267_v5 = vld [vmem:[%s1042_s25 + $0xf0] sm:$0xff]  ;;  %v266_v9 = vld [vmem:[%s1042_s25 + $0xe8] sm:$0xff]  ;;  %p591_p3 = scmp.ne.s32.totalorder %s904_s16, 1 }
  0x66   : > { %v300_v2 = vld [vmem:[%s1042_s25 + $0x1f8] sm:$0xff]  ;;  %599 = vmatprep.subr.mxu0 %v268_v1  ;;  %v299_v6 = vld [vmem:[%s1042_s25 + $0x1f0] sm:$0xff]  ;;  %v298_v10 = vld [vmem:[%s1042_s25 + $0x1e8] sm:$0xff] }
  0x67   : > { %v252_v3 = vld [vmem:[%s1042_s25 + $0x78] sm:$0xff]  ;;  %634 = vmatprep.subr.mxu1 %v300_v2  ;;  %v251_v7 = vld [vmem:[%s1042_s25 + $0x70] sm:$0xff]  ;;  %v250_v11 = vld [vmem:[%s1042_s25 + $0x68] sm:$0xff] }
  0x68   : > { %v284_v4 = vld [vmem:[%s1042_s25 + $0x178] sm:$0xff]  ;;  %600 = vmatpush3.msra.mxu0 %v252_v3  ;;  %v283_v8 = vld [vmem:[%s1042_s25 + $0x170] sm:$0xff]  ;;  %v282_v12 = vld [vmem:[%s1042_s25 + $0x168] sm:$0xff] }
  0x69   : > { %635 = vmatpush3.msra.mxu1 %v284_v4  ;;  %601 = vmatprep.subr.mxu0 %v267_v5  ;;  %v265_v13 = vld [vmem:[%s1042_s25 + $0xe0] sm:$0xff]  ;;  %v264_v17 = vld [vmem:[%s1042_s25 + $0xd8] sm:$0xff]  ;;  %v263_v21 = vld [vmem:[%s1042_s25 + $0xd0] sm:$0xff] }
  0x6a   : > { %636 = vmatprep.subr.mxu1 %v299_v6  ;;  %602 = vmatpush3.msra.mxu0 %v251_v7  ;;  %v297_v14 = vld [vmem:[%s1042_s25 + $0x1e0] sm:$0xff]  ;;  %v296_v18 = vld [vmem:[%s1042_s25 + $0x1d8] sm:$0xff]  ;;  %v295_v22 = vld [vmem:[%s1042_s25 + $0x1d0] sm:$0xff] }
  0x6b   : > { %637 = vmatpush3.msra.mxu1 %v283_v8  ;;  %603 = vmatprep.subr.mxu0 %v266_v9  ;;  %v249_v15 = vld [vmem:[%s1042_s25 + $0x60] sm:$0xff]  ;;  %v248_v19 = vld [vmem:[%s1042_s25 + $0x58] sm:$0xff]  ;;  %v247_v23 = vld [vmem:[%s1042_s25 + $0x50] sm:$0xff] }
  0x6c   : > { %638 = vmatprep.subr.mxu1 %v298_v10  ;;  %v281_v16 = vld [vmem:[%s1042_s25 + $0x160] sm:$0xff]  ;;  %604 = vmatpush3.msra.mxu0 %v250_v11  ;;  %v280_v20 = vld [vmem:[%s1042_s25 + $0x158] sm:$0xff]  ;;  %v279_v24 = vld [vmem:[%s1042_s25 + $0x150] sm:$0xff] }
  0x6d   : > { %639 = vmatpush3.msra.mxu1 %v282_v12  ;;  %605 = vmatprep.subr.mxu0 %v265_v13  ;;  %v262_v25 = vld [vmem:[%s1042_s25 + $0xc8] sm:$0xff]  ;;  %v261_v29 = vld [vmem:[%s1042_s25 + $0xc0] sm:$0xff]  ;;  %v260_v33 = vld [vmem:[%s1042_s25 + $0xb8] sm:$0xff] }
  0x6e   : > { %640 = vmatprep.subr.mxu1 %v297_v14  ;;  %606 = vmatpush3.msra.mxu0 %v249_v15  ;;  %v294_v26 = vld [vmem:[%s1042_s25 + $0x1c8] sm:$0xff]  ;;  %v293_v30 = vld [vmem:[%s1042_s25 + $0x1c0] sm:$0xff]  ;;  %v292_v34 = vld [vmem:[%s1042_s25 + $0x1b8] sm:$0xff] }
  0x6f   : > { %641 = vmatpush3.msra.mxu1 %v281_v16  ;;  %607 = vmatprep.subr.mxu0 %v264_v17  ;;  %v246_v27 = vld [vmem:[%s1042_s25 + $0x48] sm:$0xff]  ;;  %v245_v31 = vld [vmem:[%s1042_s25 + $0x40] sm:$0xff]  ;;  %v244_v35 = vld [vmem:[%s1042_s25 + $0x38] sm:$0xff] }
  0x70   : > { %642 = vmatprep.subr.mxu1 %v296_v18  ;;  %608 = vmatpush3.msra.mxu0 %v248_v19  ;;  %v278_v28 = vld [vmem:[%s1042_s25 + $0x148] sm:$0xff]  ;;  %v277_v32 = vld [vmem:[%s1042_s25 + $0x140] sm:$0xff]  ;;  %v276_v36 = vld [vmem:[%s1042_s25 + $0x138] sm:$0xff] }
  0x71   : > { %643 = vmatpush3.msra.mxu1 %v280_v20  ;;  %609 = vmatprep.subr.mxu0 %v263_v21  ;;  %v259_v37 = vld [vmem:[%s1042_s25 + $0xb0] sm:$0xff]  ;;  %v258_v41 = vld [vmem:[%s1042_s25 + $0xa8] sm:$0xff]  ;;  %v257_v45 = vld [vmem:[%s1042_s25 + $0xa0] sm:$0xff] }
  0x72   : > { %644 = vmatprep.subr.mxu1 %v295_v22  ;;  %610 = vmatpush3.msra.mxu0 %v247_v23  ;;  %v291_v38 = vld [vmem:[%s1042_s25 + $0x1b0] sm:$0xff]  ;;  %v290_v42 = vld [vmem:[%s1042_s25 + $0x1a8] sm:$0xff]  ;;  %v289_v46 = vld [vmem:[%s1042_s25 + $0x1a0] sm:$0xff] }
  0x73   : > { %645 = vmatpush3.msra.mxu1 %v279_v24  ;;  %611 = vmatprep.subr.mxu0 %v262_v25  ;;  %v243_v39 = vld [vmem:[%s1042_s25 + $0x30] sm:$0xff]  ;;  %v242_v43 = vld [vmem:[%s1042_s25 + $0x28] sm:$0xff]  ;;  %v241_v47 = vld [vmem:[%s1042_s25 + $0x20] sm:$0xff] }
  0x74   : > { %646 = vmatprep.subr.mxu1 %v294_v26  ;;  %612 = vmatpush3.msra.mxu0 %v246_v27  ;;  %v275_v40 = vld [vmem:[%s1042_s25 + $0x130] sm:$0xff]  ;;  %v274_v44 = vld [vmem:[%s1042_s25 + $0x128] sm:$0xff]  ;;  %v273_v48 = vld [vmem:[%s1042_s25 + $0x120] sm:$0xff] }
  0x75   : > { %647 = vmatpush3.msra.mxu1 %v278_v28  ;;  %613 = vmatprep.subr.mxu0 %v261_v29  ;;  %v256_v49 = vld [vmem:[%s1042_s25 + $0x98] sm:$0xff]  ;;  %v255_v53 = vld [vmem:[%s1042_s25 + $0x90] sm:$0xff]  ;;  %v254_v57 = vld [vmem:[%s1042_s25 + $0x88] sm:$0xff] }
  0x76   : > { %648 = vmatprep.subr.mxu1 %v293_v30  ;;  %614 = vmatpush3.msra.mxu0 %v245_v31  ;;  %v288_v50 = vld [vmem:[%s1042_s25 + $0x198] sm:$0xff]  ;;  %v287_v54 = vld [vmem:[%s1042_s25 + $0x190] sm:$0xff]  ;;  %v286_v58 = vld [vmem:[%s1042_s25 + $0x188] sm:$0xff] }
  0x77   : > { %649 = vmatpush3.msra.mxu1 %v277_v32  ;;  %615 = vmatprep.subr.mxu0 %v260_v33  ;;  %v240_v51 = vld [vmem:[%s1042_s25 + $0x18] sm:$0xff]  ;;  %v239_v55 = vld [vmem:[%s1042_s25 + $0x10] sm:$0xff]  ;;  %v238_v59 = vld [vmem:[%s1042_s25 + $0x8] sm:$0xff] }
  0x78   : > { %650 = vmatprep.subr.mxu1 %v292_v34  ;;  %616 = vmatpush3.msra.mxu0 %v244_v35  ;;  %v272_v52 = vld [vmem:[%s1042_s25 + $0x118] sm:$0xff]  ;;  %v271_v56 = vld [vmem:[%s1042_s25 + $0x110] sm:$0xff]  ;;  %v270_v60 = vld [vmem:[%s1042_s25 + $0x108] sm:$0xff] }
  0x79   : > { %651 = vmatpush3.msra.mxu1 %v276_v36  ;;  %617 = vmatprep.subr.mxu0 %v259_v37  ;;  %v253_v61 = vld [vmem:[%s1042_s25 + $0x80] sm:$0xff]  ;;  %v234_v0 = vld [vmem:[%s1035_s24 + $0x8] sm:$0xff]  ;;  %v236_v2 = vld [vmem:[%s1035_s24 + $0x18] sm:$0xff] }
  0x7a   : > { %652 = vmatprep.subr.mxu1 %v291_v38  ;;  %618 = vmatpush3.msra.mxu0 %v243_v39  ;;  %v285_v62 = vld [vmem:[%s1042_s25 + $0x180] sm:$0xff]  ;;  %v235_v4 = vld [vmem:[%s1035_s24 + $0x10] sm:$0xff]  ;;  %v301_v11 = vld [vmem:[#allocation2] sm:$0xff] }
  0x7b   : > { %653 = vmatpush3.msra.mxu1 %v275_v40  ;;  %619 = vmatprep.subr.mxu0 %v258_v41  ;;  %v237_v63 = vld [vmem:[%s1042_s25] sm:$0xff] }
  0x7c   : > { %654 = vmatprep.subr.mxu1 %v290_v42  ;;  %620 = vmatpush3.msra.mxu0 %v242_v43  ;;  %v269_v1 = vld [vmem:[%s1042_s25 + $0x100] sm:$0xff] }
  0x7d   : > { %655 = vmatpush3.msra.mxu1 %v274_v44  ;;  %621 = vmatprep.subr.mxu0 %v257_v45  ;;  %v233_v3 = vld [vmem:[%s1035_s24] sm:$0xff] }
  0x7e   : > { %656 = vmatprep.subr.mxu1 %v289_v46  ;;  %622 = vmatpush3.msra.mxu0 %v241_v47 }
  0x7f   : > { %657 = vmatpush3.msra.mxu1 %v273_v48  ;;  %623 = vmatprep.subr.mxu0 %v256_v49 }
  0x80   : > { %658 = vmatprep.subr.mxu1 %v288_v50  ;;  %624 = vmatpush3.msra.mxu0 %v240_v51 }
  0x81   : > { %659 = vmatpush3.msra.mxu1 %v272_v52  ;;  %625 = vmatprep.subr.mxu0 %v255_v53 }
  0x82   : > { %660 = vmatprep.subr.mxu1 %v287_v54  ;;  %626 = vmatpush3.msra.mxu0 %v239_v55 }
  0x83   : > { %661 = vmatpush3.msra.mxu1 %v271_v56  ;;  %627 = vmatprep.subr.mxu0 %v254_v57 }
  0x84   : > { %662 = vmatprep.subr.mxu1 %v286_v58  ;;  %628 = vmatpush3.msra.mxu0 %v238_v59 }
  0x85   : > { %663 = vmatpush3.msra.mxu1 %v270_v60  ;;  %629 = vmatprep.subr.mxu0 %v253_v61 }
  0x86   : > { %664 = vmatprep.subr.mxu1 %v285_v62  ;;  %630 = vmatpush3.msra.mxu0 %v237_v63 }
  0x87   : > { %366 = vmatprep.mubr.f32.mxu0 %v234_v0  ;;  %665 = vmatpush3.msra.mxu1 %v269_v1 }
  0x88   : > { %436 = vmatprep.mubr.f32.mxu1 %v236_v2  ;;  %367 = vmatmul.mubr.f32.vlgmr.msra.gmra.mxu0 %v233_v3 }
  0x89   : > { %437 = vmatmul.mubr.f32.vlgmr.msra.gmra.mxu1 %v235_v4 }
 0x148   : > { %v631_v5 = vpop.f32.mrf.mxu0 }
 0x149   : > { %v666_v6 = vpop.f32.mrf.mxu1 }
 0x14a   : > { %v632_v7 = vpop.f32.mrf.mxu0 }
 0x14b   : > { %v667_v8 = vpop.f32.mrf.mxu1  ;;  %v633_v9 = vadd.f32 %v632_v7, %v631_v5 }
 0x14c   : > { %v668_v10 = vadd.f32 %v667_v8, %v666_v6 }
 0x14e   : > { %v439_v12 = vadd.f32 %v668_v10, %v633_v9  ;;  %447 = sbr.rel (%p591_p3) target bundleno = 581 (0x245), region = 52 }
 0x150   : > { %v442_v13 = vadd.f32 %v439_v12, %v301_v11 }
 0x152   : > { %443 = vst [vmem:[#allocation2] sm:$0xff] %v442_v13 }
 0x153   : > { %v474_v32 = vlaneseq  ;;  %v449_v34 = vld [vmem:[#allocation7] sm:$0x1]  ;;  %v450_v38 = vld [vmem:[#allocation7 + $0x1] sm:$0x1]  ;;  %v592_v45 = vld [vmem:[#allocation7 + $0x2] ss:$0 sm:$0xff] }
 0x154   : > { %v593_v48 = vld [vmem:[#allocation7 + $0x3] ss:$0 sm:$0xff]  ;;  %vm503_vm0 = vcmask 7168  }
 0x155   : > { %v475_v33 = vshrl.u32 %v474_v32, 7 }
 0x157   : > { %v476_v35 = vsub.s32 0, %v475_v33 }
 0x159   : > { %v448_v14 = vld [vmem:[#allocation2] sm:$0xff] }
 0x15a   : > { %v453_v15 = vrot.slane %v448_v14, 4 }
 0x15c   : > { %v454_v16 = vadd.f32 %v453_v15, %v448_v14 }
 0x15e   : > { %v455_v17 = vrot.slane %v454_v16, 2 }
 0x160   : > { %v456_v18 = vadd.f32 %v455_v17, %v454_v16 }
 0x162   : > { %v457_v19 = vrot.slane %v456_v18, 1 }
 0x164   : > { %v458_v20 = vadd.f32 %v457_v19, %v456_v18 }
 0x166   : > { %v459_v21 = vmul.f32 0.125, %v458_v20 }
 0x168   : > { %v460_v22 = vsub.f32 %v448_v14, %v459_v21 }
 0x16a   : > { %v461_v23 = vmul.f32 %v460_v22, %v460_v22 }
 0x16c   : > { %v462_v24 = vrot.slane %v461_v23, 4 }
 0x16e   : > { %v463_v25 = vadd.f32 %v462_v24, %v461_v23 }
 0x170   : > { %v464_v26 = vrot.slane %v463_v25, 2 }
 0x172   : > { %v465_v27 = vadd.f32 %v464_v26, %v463_v25 }
 0x174   : > { %v466_v28 = vrot.slane %v465_v27, 1 }
 0x176   : > { %v467_v29 = vadd.f32 %v466_v28, %v465_v27 }
 0x178   : > { %v468_v30 = vmul.f32 0.125, %v467_v29 }
 0x17a   : > { %v469_v31 = vadd.f32 1e-05, %v468_v30 }
 0x17c   : > { %727 = vrsqrt.f32 %v469_v31 }
 0x189   : > { %v728_v36 = vpop.eup %727 }
 0x18a   : > { %v471_v37 = vmul.f32 %v728_v36, %v449_v34 }
 0x18c   : > { %v472_v39 = vmul.f32 %v471_v37, %v459_v21  ;;  %v477_v40 = vrot.slane %v471_v37, %v476_v35 }
 0x18e   : > { %v473_v41 = vsub.f32 %v450_v38, %v472_v39  ;;  %v478_v42 = vmul.f32 %v477_v40, %v448_v14 }
 0x190   : > { %v482_v43 = vrot.slane %v473_v41, %v476_v35 }
 0x192   : > { %v483_v44 = vadd.f32 %v482_v43, %v478_v42 }
 0x194   : > { %v484_v46 = vmax.f32 %v483_v44, 0.0 }
 0x196   : > { %v489_v47 = vmul.f32 %v592_v45, %v484_v46 }
 0x198   : > { %490 = vadd.xlane.f32.xlu0 %v489_v47 }
 0x221   : > { %v491_v49 = vpop.xlane.xlu0 %490 }
 0x222   : > { %v496_v50 = vadd.f32 %v593_v48, %v491_v49 }
 0x224   : > { %v594_v51 = vmul.f32 -1.442695, %v496_v50 }
 0x226   : > { %729 = vpow2.f32 %v594_v51 }
 0x233   : > { %v730_v52 = vpop.eup %729 }
 0x234   : > { %v500_v53 = vadd.f32 1.0, %v730_v52 }
 0x236   : > { %731 = vrcp.f32 %v500_v53 }
 0x243   : > { %v732_v54 = vpop.eup %731 }
 0x244   : > { %504 = vst.msk [vmem:[%s1142_s3] sm:$0xff] %vm503_vm0, %v732_v54 }
 0x245 PF: > { %p16_p2 = scmp.ge.s32.totalorder %s907_s17, 4   ;;  %s1153_s12 = smov %s849_s13 }
 0x246   : > { %s1154_s13 = smov %s853_s14  ;;  %s1155_s14 = smov %s917_s20 }
 0x247   : > { %s1156_s15 = smov %s907_s17  ;;  %18 = sbr.rel (!%p16_p2) target bundleno = 5 (0x5), region = 93 }
 0x24c   :  { %516 = vsyncpa [#allocation4], 1 }
 0x24d   :  { %518 = vsyncpa [#allocation4 + $0x1], 1 }
 0x24e   :  { %519 = vsyncpa [#allocation6], 1 }
 0x24f   :  { %521 = vsyncpa [#allocation6 + $0x1], 1 }

</bundles_post_ra>
